<compile_context>
chip_gen: v5e
topology: v5e:2x2
jax: 0.10.0
libtpu: 0.0.40
codegen_flags: <defaults>
</compile_context>

<pallas_src>
import math

import jax
import jax.numpy as jnp
from jax.experimental import pallas as pl
from jax.experimental.pallas import tpu as pltpu


def _gate_fusion_kernel(x1_ref, x2_ref, w1_ref, w2_ref, b_ref, o_ref):
    # Two MXU matmuls accumulating in f32 + bias, sigmoid via EUP exp + div,
    # gate multiply on the VPU in the activation dtype.
    x2 = x2_ref[...]
    logits = (
        jnp.dot(x1_ref[...], w1_ref[...], preferred_element_type=jnp.float32)
        + jnp.dot(x2, w2_ref[...], preferred_element_type=jnp.float32)
        + b_ref[...].astype(jnp.float32)  # (1, out_dim) broadcasts over rows
    )
    gate = 1.0 / (1.0 + jnp.exp(-logits))          # sigmoid, exact
    gate = gate.astype(x2.dtype)                   # gate in native dtype
    o_ref[...] = (gate * x2).astype(o_ref.dtype)


def _round_up(x, n):
    return ((x + n - 1) // n) * n


def _vmem_budget_bytes():
    """Generation-aware scoped-VMEM budget (~75% of physical VMEM)."""
    try:
        cap = int(pltpu.get_tpu_info().vmem_capacity_bytes)
    except Exception:
        cap = 64 * 1024 * 1024  # conservative default (v7x per-TC VMEM)
    # 128 MiB (v5e/v6e) -> 96 MiB budget; 64 MiB (v7x) -> 48 MiB budget.
    return min(cap * 3 // 4, 100 * 1024 * 1024)


def _pick_tm(m, d1, d2, out_dim, x_item, w_item, o_item, budget, weight_bufs):
    """Row-tile size: budget-aware, balanced, even-count for large M."""
    # Resident blocks (W1, W2, bias) -- single-buffered when Buffered(1) is
    # honoured, double otherwise -- plus a fixed margin for compiler scratch.
    fixed = weight_bufs * (d1 + d2) * out_dim * w_item
    fixed += weight_bufs * 8 * _round_up(out_dim, 128) * w_item  # bias tile
    fixed += 1 << 20

    # Per-row cost: double-buffered x1/x2/out tiles + f32 logits intermediates
    # (two partial dot results + the summed logits).
    per_row = (
        2 * (d1 + d2) * x_item
        + 2 * out_dim * o_item
        + 3 * out_dim * 4
    )
    avail = max(budget - fixed, per_row * 8)
    tm_max = max(8, min(2048, (avail // per_row) // 8 * 8))

    # Balance tiles so the trailing tile is (nearly) full instead of a
    # 1024/176-style split that wastes MXU/VPU work.
    n_tiles = -(-m // tm_max)
    # v7x has 2 TensorCores: for large M prefer an even number of equal tiles
    # so the "parallel" axis shards with balanced load (no-op on 1-TC chips).
    if m >= 1024 and n_tiles % 2 == 1:
        n_tiles += 1
    tm = min(_round_up(-(-m // n_tiles), 8), tm_max)
    return max(8, tm)


def gate_fusion(x1, x2, w, b):
    """x1: [..., D1], x2: [..., D2]; w: [D1+D2, out_dim], b: [out_dim].

    Requires out_dim == D2 (needed for the elementwise gate * x2).
    """
    d1 = x1.shape[-1]
    d2 = x2.shape[-1]
    out_dim = w.shape[-1]
    assert w.shape[0] == d1 + d2 and out_dim == d2

    lead = x1.shape[:-1]
    m = int(math.prod(lead)) if lead else 1
    x1f = x1.reshape(m, d1)
    x2f = x2.reshape(m, d2)

    w1 = w[:d1, :]
    w2 = w[d1:, :]
    b2d = b.reshape(1, out_dim)

    x_item = jnp.dtype(x2.dtype).itemsize
    w_item = jnp.dtype(w.dtype).itemsize
    o_item = x_item
    budget = _vmem_budget_bytes()

    cost = pl.CostEstimate(
        flops=2 * m * (d1 + d2) * out_dim,
        transcendentals=m * out_dim,  # sigmoid
        bytes_accessed=(
            m * (d1 + d2 + out_dim) * x_item
            + ((d1 + d2) * out_dim + out_dim) * w_item
        ),
    )

    def _build_and_call(single_buffer_weights):
        weight_bufs = 1 if single_buffer_weights else 2
        tm = _pick_tm(m, d1, d2, out_dim, x_item, w_item, o_item,
                      budget, weight_bufs)
        grid = (pl.cdiv(m, tm),)
        res_kwargs = (
            dict(pipeline_mode=pl.Buffered(1)) if single_buffer_weights else {}
        )
        return pl.pallas_call(
            _gate_fusion_kernel,
            out_shape=jax.ShapeDtypeStruct((m, out_dim), x2.dtype),
            grid=grid,
            in_specs=[
                pl.BlockSpec((tm, d1), lambda i: (i, 0)),                  # x1
                pl.BlockSpec((tm, d2), lambda i: (i, 0)),                  # x2
                pl.BlockSpec((d1, out_dim), lambda i: (0, 0), **res_kwargs),  # W1
                pl.BlockSpec((d2, out_dim), lambda i: (0, 0), **res_kwargs),  # W2
                pl.BlockSpec((1, out_dim), lambda i: (0, 0), **res_kwargs),   # b
            ],
            out_specs=pl.BlockSpec((tm, out_dim), lambda i: (i, 0)),
            compiler_params=pltpu.CompilerParams(
                dimension_semantics=("parallel",),
                vmem_limit_bytes=budget,
            ),
            cost_estimate=cost,
        )(x1f, x2f, w1, w2, b2d)

    try:
        out = _build_and_call(True)
    except Exception:
        # Fallback: this JAX/Mosaic build does not accept single-buffered
        # (pl.Buffered(1)) resident blocks -> use default double-buffering
        # and re-budget the tile size accordingly.
        out = _build_and_call(False)

    return out.reshape(*lead, out_dim)


def _reference(x1, x2, w, b):
    xcat = jnp.concatenate([x1, x2], axis=-1)
    gate = jax.nn.sigmoid(xcat @ w + b)
    return gate * x2  # dropout is identity in eval mode


def _run_case(key, B, S, D1, D2, atol=1e-5, rtol=1e-5):
    input_dim, out_dim = D1 + D2, D2
    k1, k2, kw, kb = jax.random.split(key, 4)
    x1 = jax.random.normal(k1, (B, S, D1), dtype=jnp.float32)
    x2 = jax.random.normal(k2, (B, S, D2), dtype=jnp.float32)
    # Deterministic init matching torch.nn.Linear's uniform bounds.
    bound = 1.0 / (input_dim ** 0.5)
    w = jax.random.uniform(kw, (input_dim, out_dim), jnp.float32, -bound, bound)
    b = jax.random.uniform(kb, (out_dim,), jnp.float32, -bound, bound)

    y = gate_fusion(x1, x2, w, b)
    y = jax.block_until_ready(y)
    y_ref = _reference(x1, x2, w, b)

    assert y.shape == (B, S, out_dim)
    assert jnp.allclose(y, y_ref, atol=atol, rtol=rtol)


if __name__ == "__main__":
    key = jax.random.PRNGKey(0)
    ka, kb_ = jax.random.split(key)

    # Case 1: small out_dim (32) -> native-width (masked-store) output path.
    _run_case(ka, B=2, S=8, D1=32, D2=32)

    # Case 2: lane-dense out_dim (128), m = 1200 -> balanced 2-tile split
    # (2 x 600 rows) exercising the pipelined / 2-TC-shardable path.
    _run_case(kb_, B=3, S=400, D1=64, D2=128)

    print("KERNEL_OK")
</pallas_src>

<mosaic_0001>
module attributes {stable_mosaic.version = 11 : i64} {
  func.func @_gate_fusion_kernel(%arg0: i32, %arg1: memref<16x32xf32, #tpu.memory_space<vmem>>, %arg2: memref<16x32xf32, #tpu.memory_space<vmem>>, %arg3: memref<32x32xf32, #tpu.memory_space<vmem>>, %arg4: memref<32x32xf32, #tpu.memory_space<vmem>>, %arg5: memref<1x32xf32, #tpu.memory_space<vmem>>, %arg6: memref<16x32xf32, #tpu.memory_space<vmem>>) attributes {dimension_semantics = [#tpu.dimension_semantics<parallel>], iteration_bounds = array<i64: 1>, scalar_prefetch = 0 : i64, scratch_operands = 0 : i64, tpu.core_type = #tpu.core_type<tc>, window_params = [{transform_indices = @transform_0, window_bounds = array<i64: 16, 32>}, {transform_indices = @transform_1, window_bounds = array<i64: 16, 32>}, {pipeline_mode = #tpu.pipeline_mode<synchronous>, transform_indices = @transform_2, window_bounds = array<i64: 32, 32>}, {pipeline_mode = #tpu.pipeline_mode<synchronous>, transform_indices = @transform_3, window_bounds = array<i64: 32, 32>}, {pipeline_mode = #tpu.pipeline_mode<synchronous>, transform_indices = @transform_4, window_bounds = array<i64: 1, 32>}, {transform_indices = @transform_5, window_bounds = array<i64: 16, 32>}]} {
    %c0 = arith.constant 0 : index
    %c0_0 = arith.constant 0 : index
    %0 = vector.load %arg2[%c0, %c0_0] : memref<16x32xf32, #tpu.memory_space<vmem>>, vector<16x32xf32>
    %c0_1 = arith.constant 0 : index
    %c0_2 = arith.constant 0 : index
    %1 = vector.load %arg1[%c0_1, %c0_2] : memref<16x32xf32, #tpu.memory_space<vmem>>, vector<16x32xf32>
    %c0_3 = arith.constant 0 : index
    %c0_4 = arith.constant 0 : index
    %2 = vector.load %arg3[%c0_3, %c0_4] : memref<32x32xf32, #tpu.memory_space<vmem>>, vector<32x32xf32>
    %cst = arith.constant dense<0.000000e+00> : vector<16x32xf32>
    %3 = tpu.matmul %1, %2, %cst {dimension_numbers = #tpu.dot_dimension_numbers<[1], [0], [0], [1], [0, 0, 1, 1], [], []>} : vector<16x32xf32>, vector<32x32xf32>, vector<16x32xf32> -> vector<16x32xf32>
    %c0_5 = arith.constant 0 : index
    %c0_6 = arith.constant 0 : index
    %4 = vector.load %arg4[%c0_5, %c0_6] : memref<32x32xf32, #tpu.memory_space<vmem>>, vector<32x32xf32>
    %cst_7 = arith.constant dense<0.000000e+00> : vector<16x32xf32>
    %5 = tpu.matmul %0, %4, %cst_7 {dimension_numbers = #tpu.dot_dimension_numbers<[1], [0], [0], [1], [0, 0, 1, 1], [], []>} : vector<16x32xf32>, vector<32x32xf32>, vector<16x32xf32> -> vector<16x32xf32>
    %6 = arith.addf %3, %5 : vector<16x32xf32>
    %c0_8 = arith.constant 0 : index
    %c0_9 = arith.constant 0 : index
    %7 = vector.load %arg5[%c0_8, %c0_9] : memref<1x32xf32, #tpu.memory_space<vmem>>, vector<1x32xf32>
    %8 = vector.broadcast %7 : vector<1x32xf32> to vector<16x32xf32>
    %9 = arith.addf %6, %8 : vector<16x32xf32>
    %cst_10 = arith.constant 0.000000e+00 : f32
    %10 = vector.broadcast %cst_10 : f32 to vector<16x32xf32>
    %11 = arith.subf %10, %9 : vector<16x32xf32>
    %12 = math.exp %11 : vector<16x32xf32>
    %cst_11 = arith.constant 1.000000e+00 : f32
    %13 = vector.broadcast %cst_11 : f32 to vector<16x32xf32>
    %14 = arith.addf %13, %12 : vector<16x32xf32>
    %cst_12 = arith.constant 1.000000e+00 : f32
    %15 = vector.broadcast %cst_12 : f32 to vector<16x32xf32>
    %16 = arith.divf %15, %14 : vector<16x32xf32>
    %17 = arith.mulf %16, %0 : vector<16x32xf32>
    %c0_13 = arith.constant 0 : index
    %c0_14 = arith.constant 0 : index
    %18 = vector.load %arg6[%c0_13, %c0_14] : memref<16x32xf32, #tpu.memory_space<vmem>>, vector<16x32xf32>
    tpu.vector_store %arg6[%c0_13, %c0_14], %17 {strides = array<i32>} : memref<16x32xf32, #tpu.memory_space<vmem>>, vector<16x32xf32>,
    return
  }
  func.func @transform_0(%arg0: i32) -> (i32, i32) {
    %c0_i32 = arith.constant 0 : i32
    %c0_i32_0 = arith.constant 0 : i32
    return %arg0, %c0_i32 : i32, i32
  }
  func.func @transform_1(%arg0: i32) -> (i32, i32) {
    %c0_i32 = arith.constant 0 : i32
    %c0_i32_0 = arith.constant 0 : i32
    return %arg0, %c0_i32 : i32, i32
  }
  func.func @transform_2(%arg0: i32) -> (i32, i32) {
    %c0_i32 = arith.constant 0 : i32
    %c0_i32_0 = arith.constant 0 : i32
    %c0_i32_1 = arith.constant 0 : i32
    return %c0_i32, %c0_i32_0 : i32, i32
  }
  func.func @transform_3(%arg0: i32) -> (i32, i32) {
    %c0_i32 = arith.constant 0 : i32
    %c0_i32_0 = arith.constant 0 : i32
    %c0_i32_1 = arith.constant 0 : i32
    return %c0_i32, %c0_i32_0 : i32, i32
  }
  func.func @transform_4(%arg0: i32) -> (i32, i32) {
    %c0_i32 = arith.constant 0 : i32
    %c0_i32_0 = arith.constant 0 : i32
    %c0_i32_1 = arith.constant 0 : i32
    return %c0_i32, %c0_i32_0 : i32, i32
  }
  func.func @transform_5(%arg0: i32) -> (i32, i32) {
    %c0_i32 = arith.constant 0 : i32
    %c0_i32_0 = arith.constant 0 : i32
    return %arg0, %c0_i32 : i32, i32
  }
}

module attributes {stable_mosaic.version = 11 : i64} {
  func.func @_gate_fusion_kernel(%arg0: i32, %arg1: memref<16x32xf32, #tpu.memory_space<vmem>>, %arg2: memref<16x32xf32, #tpu.memory_space<vmem>>, %arg3: memref<32x32xf32, #tpu.memory_space<vmem>>, %arg4: memref<32x32xf32, #tpu.memory_space<vmem>>, %arg5: memref<1x32xf32, #tpu.memory_space<vmem>>, %arg6: memref<16x32xf32, #tpu.memory_space<vmem>>) attributes {dimension_semantics = [#tpu.dimension_semantics<parallel>], iteration_bounds = array<i64: 1>, scalar_prefetch = 0 : i64, scratch_operands = 0 : i64, tpu.core_type = #tpu.core_type<tc>, window_params = [{transform_indices = @transform_0, window_bounds = array<i64: 16, 32>}, {transform_indices = @transform_1, window_bounds = array<i64: 16, 32>}, {pipeline_mode = #tpu.pipeline_mode<synchronous>, transform_indices = @transform_2, window_bounds = array<i64: 32, 32>}, {pipeline_mode = #tpu.pipeline_mode<synchronous>, transform_indices = @transform_3, window_bounds = array<i64: 32, 32>}, {pipeline_mode = #tpu.pipeline_mode<synchronous>, transform_indices = @transform_4, window_bounds = array<i64: 1, 32>}, {transform_indices = @transform_5, window_bounds = array<i64: 16, 32>}]} {
    %c0 = arith.constant 0 : index
    %c0_0 = arith.constant 0 : index
    %0 = vector.load %arg2[%c0, %c0_0] : memref<16x32xf32, #tpu.memory_space<vmem>>, vector<16x32xf32>
    %c0_1 = arith.constant 0 : index
    %c0_2 = arith.constant 0 : index
    %1 = vector.load %arg1[%c0_1, %c0_2] : memref<16x32xf32, #tpu.memory_space<vmem>>, vector<16x32xf32>
    %c0_3 = arith.constant 0 : index
    %c0_4 = arith.constant 0 : index
    %2 = vector.load %arg3[%c0_3, %c0_4] : memref<32x32xf32, #tpu.memory_space<vmem>>, vector<32x32xf32>
    %cst = arith.constant dense<0.000000e+00> : vector<16x32xf32>
    %3 = tpu.matmul %1, %2, %cst {dimension_numbers = #tpu.dot_dimension_numbers<[1], [0], [0], [1], [0, 0, 1, 1], [], []>} : vector<16x32xf32>, vector<32x32xf32>, vector<16x32xf32> -> vector<16x32xf32>
    %c0_5 = arith.constant 0 : index
    %c0_6 = arith.constant 0 : index
    %4 = vector.load %arg4[%c0_5, %c0_6] : memref<32x32xf32, #tpu.memory_space<vmem>>, vector<32x32xf32>
    %cst_7 = arith.constant dense<0.000000e+00> : vector<16x32xf32>
    %5 = tpu.matmul %0, %4, %cst_7 {dimension_numbers = #tpu.dot_dimension_numbers<[1], [0], [0], [1], [0, 0, 1, 1], [], []>} : vector<16x32xf32>, vector<32x32xf32>, vector<16x32xf32> -> vector<16x32xf32>
    %6 = arith.addf %3, %5 : vector<16x32xf32>
    %c0_8 = arith.constant 0 : index
    %c0_9 = arith.constant 0 : index
    %7 = vector.load %arg5[%c0_8, %c0_9] : memref<1x32xf32, #tpu.memory_space<vmem>>, vector<1x32xf32>
    %8 = vector.broadcast %7 : vector<1x32xf32> to vector<16x32xf32>
    %9 = arith.addf %6, %8 : vector<16x32xf32>
    %cst_10 = arith.constant 0.000000e+00 : f32
    %10 = vector.broadcast %cst_10 : f32 to vector<16x32xf32>
    %11 = arith.subf %10, %9 : vector<16x32xf32>
    %12 = math.exp %11 : vector<16x32xf32>
    %cst_11 = arith.constant 1.000000e+00 : f32
    %13 = vector.broadcast %cst_11 : f32 to vector<16x32xf32>
    %14 = arith.addf %13, %12 : vector<16x32xf32>
    %cst_12 = arith.constant 1.000000e+00 : f32
    %15 = vector.broadcast %cst_12 : f32 to vector<16x32xf32>
    %16 = arith.divf %15, %14 : vector<16x32xf32>
    %17 = arith.mulf %16, %0 : vector<16x32xf32>
    %c0_13 = arith.constant 0 : index
    %c0_14 = arith.constant 0 : index
    %18 = vector.load %arg6[%c0_13, %c0_14] : memref<16x32xf32, #tpu.memory_space<vmem>>, vector<16x32xf32>
    tpu.vector_store %arg6[%c0_13, %c0_14], %17 {strides = array<i32>} : memref<16x32xf32, #tpu.memory_space<vmem>>, vector<16x32xf32>,
    return
  }
  func.func @transform_0(%arg0: i32) -> (i32, i32) {
    %c0_i32 = arith.constant 0 : i32
    %c0_i32_0 = arith.constant 0 : i32
    return %arg0, %c0_i32 : i32, i32
  }
  func.func @transform_1(%arg0: i32) -> (i32, i32) {
    %c0_i32 = arith.constant 0 : i32
    %c0_i32_0 = arith.constant 0 : i32
    return %arg0, %c0_i32 : i32, i32
  }
  func.func @transform_2(%arg0: i32) -> (i32, i32) {
    %c0_i32 = arith.constant 0 : i32
    %c0_i32_0 = arith.constant 0 : i32
    %c0_i32_1 = arith.constant 0 : i32
    return %c0_i32, %c0_i32_0 : i32, i32
  }
  func.func @transform_3(%arg0: i32) -> (i32, i32) {
    %c0_i32 = arith.constant 0 : i32
    %c0_i32_0 = arith.constant 0 : i32
    %c0_i32_1 = arith.constant 0 : i32
    return %c0_i32, %c0_i32_0 : i32, i32
  }
  func.func @transform_4(%arg0: i32) -> (i32, i32) {
    %c0_i32 = arith.constant 0 : i32
    %c0_i32_0 = arith.constant 0 : i32
    %c0_i32_1 = arith.constant 0 : i32
    return %c0_i32, %c0_i32_0 : i32, i32
  }
  func.func @transform_5(%arg0: i32) -> (i32, i32) {
    %c0_i32 = arith.constant 0 : i32
    %c0_i32_0 = arith.constant 0 : i32
    return %arg0, %c0_i32 : i32, i32
  }
}

</mosaic_0001>

<bundles_post_ra>
// kernel: tpu_custom_call.1
= control target key start
LH: loop header
LB: loop body
LE: loop exit
PB: predicated region body
PF: predicated region fallthrough
CT: control target
= control target key end

     0   :  { %10 = vsyncpa [#allocation3], 0  ;;  %s460_s0 = inlined_call_operand.hbm [shape: f32[16,32], index: 0, kind: input, shape index: {}]   ;;  %s461_s1 = inlined_call_operand.hbm [shape: f32[16,32], index: 1, kind: input, shape index: {}]   ;;  %s462_s2 = inlined_call_operand.hbm [shape: f32[32,32], index: 2, kind: input, shape index: {}]   ;;  %s463_s3 = inlined_call_operand.hbm [shape: f32[32,32], index: 3, kind: input, shape index: {}]   ;;  %s464_s4 = inlined_call_operand.vmem [shape: f32[1,32], index: 4, kind: input, shape index: {}]   ;;  %s465_s5 = inlined_call_operand.hbm [shape: f32[16,32], index: 5, kind: output, shape index: {}]  }
   0x1   :  { %11 = vsyncpa [#allocation6], 0 }
   0x2   :  { %12 = vsyncpa [#allocation9], 0 }
   0x3   :  { %13 = vsyncpa [#allocation4], 0  ;;  %s31_s20 = sshll.u32 %s461_s1, 4  ;;  %s380_s21 = smov [#allocation5]   ;;  %s32_s20 = int_to_ptr.hbm [resolvable:$true] %s31_s20 }
   0x4   :  { %s33_s22 = sshll.u32 %s380_s21, 4  ;;  %s18_s25 = sshll.u32 %s460_s0, 4  ;;  %s34_s22 = int_to_ptr.vmem [resolvable:$true] %s33_s22  ;;  %s19_s25 = int_to_ptr.hbm [resolvable:$true] %s18_s25 }
   0x5   :  { %s381_s26 = smov 128   ;;  %s382_s27 = smov 8  }
   0x6   :  { %39 = dma.hbm_to_vmem [thread:$0]  %s32_s20, 256, %s34_s22, [#allocation6], %s381_s26, %s381_s26, %s382_s27  }
   0x7   :  { %s383_s28 = smov [#allocation2]   ;;  %s44_s1 = sshll.u32 %s462_s2, 4  ;;  %s45_s1 = int_to_ptr.hbm [resolvable:$true] %s44_s1 }
   0x8   :  { %s20_s29 = sshll.u32 %s383_s28, 4  ;;  %s57_s8 = sshll.u32 %s463_s3, 4  ;;  %s21_s29 = int_to_ptr.vmem [resolvable:$true] %s20_s29  ;;  %s58_s8 = int_to_ptr.hbm [resolvable:$true] %s57_s8 }
   0x9   :  { %26 = dma.hbm_to_vmem [thread:$0]  %s19_s25, 256, %s21_s29, [#allocation3], %s381_s26, %s381_s26, %s382_s27  }
   0xa   :  { %s384_s9 = smov [#allocation7]   ;;  %s385_s11 = smov [#allocation8]  }
   0xb   :  { %s46_s10 = sshll.u32 %s384_s9, 4  ;;  %s59_s2 = sshll.u32 %s385_s11, 4  ;;  %s47_s10 = int_to_ptr.vmem [resolvable:$true] %s46_s10  ;;  %s60_s2 = int_to_ptr.vmem [resolvable:$true] %s59_s2 }
   0xc   :  { %52 = dma.hbm_to_vmem [thread:$0]  %s45_s1, 512, %s47_s10, [#allocation6], %s381_s26, %s381_s26, %s382_s27  }
   0xd   :  { %65 = dma.hbm_to_vmem [thread:$0]  %s58_s8, 512, %s60_s2, [#allocation9], %s381_s26, %s381_s26, %s382_s27  }
   0xe   :  { %372 = dma.done.wait [#allocation3], 256  }
   0xf   :  { %373 = vsyncadd [#allocation3], 4294967040 }
  0x10   :  { %374 = dma.done.wait [#allocation6], 768  }
  0x11   :  { %375 = vsyncadd [#allocation6], 4294966528 }
  0x12   :  { %376 = dma.done.wait [#allocation9], 512  }
  0x13   :  { %377 = vsyncadd [#allocation9], 4294966784  ;;  %v95_v0 = vld [vmem:[#allocation8 + $0x18] sm:$0xff]  ;;  %v94_v2 = vld [vmem:[#allocation8 + $0x10] sm:$0xff]  ;;  %vm96_vm0 = vcmask 261120   ;;  %s209_s16 = sshll.u32 %s465_s5, 4  ;;  %s210_s16 = int_to_ptr.hbm [resolvable:$true] %s209_s16 }
  0x14   :  { %v91_v1 = vld [vmem:[#allocation7 + $0x18] sm:$0xff]  ;;  %115 = vmatpush.msra.mxu0 %v95_v0  ;;  %228 = vmatpush.msra.mxu2 %v95_v0  ;;  %v90_v3 = vld [vmem:[#allocation7 + $0x10] sm:$0xff]  ;;  %v93_v4 = vld [vmem:[#allocation8 + $0x8] sm:$0xff] }
  0x15   :  { %144 = vmatpush.msra.mxu1 %v91_v1  ;;  %232 = vmatpush.msra.mxu3 %v91_v1  ;;  %v89_v5 = vld [vmem:[#allocation7 + $0x8] sm:$0xff]  ;;  %v92_v6 = vld [vmem:[#allocation8] sm:$0xff]  ;;  %v84_v8 = vld [vmem:[#allocation5] sm:$0xff] }
  0x16   :  { %116 = vmatpush.msra.mxu0 %v94_v2  ;;  %229 = vmatpush.msra.mxu2 %v94_v2  ;;  %v88_v7 = vld [vmem:[#allocation7] sm:$0xff]  ;;  %v441_v9 = vld [vmem:[#allocation5 + $0x8] sm:$0xff]  ;;  %v87_v11 = vld [vmem:[#allocation2 + $0x8] sm:$0xff] }
  0x17   :  { %145 = vmatpush.msra.mxu1 %v90_v3  ;;  %233 = vmatpush.msra.mxu3 %v90_v3  ;;  %v86_v10 = vld [vmem:[#allocation2] sm:$0xff] }
  0x18   :  { %117 = vmatpush.msra.mxu0 %v93_v4  ;;  %230 = vmatpush.msra.mxu2 %v93_v4  ;;  %v243_v13 = vld [vmem:[%s464_s4] ss:$0 sm:$0xff]  ;;  %s386_s4 = smov [#allocation10]  }
  0x19   :  { %146 = vmatpush.msra.mxu1 %v89_v5  ;;  %234 = vmatpush.msra.mxu3 %v89_v5  ;;  %s207_s13 = sshll.u32 %s386_s4, 4  ;;  %s208_s13 = int_to_ptr.vmem [resolvable:$true] %s207_s13 }
  0x1a   :  { %118 = vmatpush.msra.mxu0 %v92_v6  ;;  %231 = vmatpush.msra.mxu2 %v92_v6 }
  0x1b   :  { %147 = vmatpush.msra.mxu1 %v88_v7  ;;  %235 = vmatpush.msra.mxu3 %v88_v7 }
  0x1c   :  { %224 = vmatmul.msk.f32.vlgmr.msra.gmra.mxu0 %vm96_vm0, %v84_v8  ;;  %225 = vmatmul.msk.f32.vlgmr.msra.gmra.mxu2 %vm96_vm0, %v441_v9 }
  0x1d   :  { %226 = vmatmul.msk.f32.vlgmr.msra.gmra.mxu1 %vm96_vm0, %v86_v10  ;;  %227 = vmatmul.msk.f32.vlgmr.msra.gmra.mxu3 %vm96_vm0, %v87_v11 }
  0x99   :  { %v120_v12 = vpop.f32.mrf.mxu0 }
  0x9a   :  { %v149_v14 = vpop.f32.mrf.mxu1 }
  0x9b   :  { %v150_v15 = vadd.f32 %v149_v14, %v120_v12 }
  0x9d   :  { %v159_v16 = vadd.f32 %v243_v13, %v150_v15 }
  0x9f   :  { %v161_v17 = vsub.f32 0.0, %v159_v16  ;;  %v123_v18 = vpop.f32.mrf.mxu2 }
  0xa0   :  { %v152_v19 = vpop.f32.mrf.mxu3 }
  0xa1   :  { %v163_v20 = vmul.f32 1.442695, %v161_v17  ;;  %v153_v21 = vadd.f32 %v152_v19, %v123_v18 }
  0xa3   :  { %244 = vpow2.f32 %v163_v20  ;;  %v160_v22 = vadd.f32 %v243_v13, %v153_v21 }
  0xa5   :  { %v162_v23 = vsub.f32 0.0, %v160_v22 }
  0xa7   :  { %v165_v24 = vmul.f32 1.442695, %v162_v23 }
  0xa9   :  { %v245_v25 = vpop.eup %244  ;;  %246 = vpow2.f32 %v165_v24 }
  0xaa   :  { %v167_v26 = vadd.f32 1.0, %v245_v25 }
  0xac   :  { %248 = vrcp.f32 %v167_v26  ;;  %v180_v32 = vand.u32 2147483648, %v167_v26  ;;  %vm174_vm1 = vweird.f32 %v167_v26  ;;  %v178_v34 = vand.u32 2147483647, %v167_v26 }
  0xae   :  { %v181_v38 = vor.u32 1.1754944e-38, %v180_v32  ;;  %vm179_vm4 = vcmp.eq.f32.partialorder %v178_v34, 8.507059e+37 }
  0xaf   :  { %v247_v27 = vpop.eup %246 }
  0xb0   :  { %v168_v28 = vadd.f32 1.0, %v247_v27 }
  0xb2   :  { %v249_v29 = vpop.eup %248  ;;  %250 = vrcp.f32 %v168_v28  ;;  %v195_v42 = vand.u32 2147483648, %v168_v28  ;;  %v193_v44 = vand.u32 2147483647, %v168_v28  ;;  %vm189_vm6 = vweird.f32 %v168_v28 }
  0xb3   :  { %v170_v30 = vmul.f32 %v249_v29, %v167_v26  ;;  %vm175_vm2 = vweird.f32 %v249_v29 }
  0xb4   :  { %vm176_vm3 = vmor %vm174_vm1, %vm175_vm2  ;;  %v196_v47 = vor.u32 1.1754944e-38, %v195_v42  ;;  %vm194_vm8 = vcmp.eq.f32.partialorder %v193_v44, 8.507059e+37 }
  0xb5   :  { %v171_v31 = vsub.f32 1.0, %v170_v30 }
  0xb7   :  { %v172_v33 = vmul.f32 %v249_v29, %v171_v31 }
  0xb8   :  { %v251_v35 = vpop.eup %250 }
  0xb9   :  { %v185_v36 = vmul.f32 %v251_v35, %v168_v28  ;;  %v173_v37 = vadd.f32 %v249_v29, %v172_v33  ;;  %vm190_vm5 = vweird.f32 %v251_v35 }
  0xba   :  { %vm191_vm7 = vmor %vm189_vm6, %vm190_vm5 }
  0xbb   :  { %v186_v39 = vsub.f32 1.0, %v185_v36  ;;  %v177_v40 = vsel %vm176_vm3, %v249_v29, %v173_v37 }
  0xbc   :  { %v182_v41 = vsel %vm179_vm4, %v181_v38, %v177_v40 }
  0xbd   :  { %v187_v43 = vmul.f32 %v251_v35, %v186_v39  ;;  %v199_v45 = vmul.f32 %v182_v41, %v84_v8 }
  0xbf   :  { %v188_v46 = vadd.f32 %v251_v35, %v187_v43  ;;  %201 = vst.msk [vmem:[#allocation10] sm:$0xff] %vm96_vm0, %v199_v45 }
  0xc1   :  { %v192_v48 = vsel %vm191_vm7, %v251_v35, %v188_v46 }
  0xc2   :  { %v197_v49 = vsel %vm194_vm8, %v196_v47, %v192_v48 }
  0xc3   :  { %v200_v50 = vmul.f32 %v197_v49, %v441_v9 }
  0xc5   :  { %202 = vst.msk [vmem:[#allocation10 + $0x8] sm:$0xff] %vm96_vm0, %v200_v50 }
  0xc6   :  { %215 = dma.vmem_to_hbm [thread:$0]  %s208_s13, 256, %s210_s16, [#allocation4], %s381_s26, %s381_s26, %s382_s27  }
  0xc7   :  { %378 = dma.done.wait [#allocation4], 256  }
  0xc8   :  { %379 = vsyncadd [#allocation4], 4294967040 }
  0xc9   :  { %220 = vsyncpa [#allocation3], 1 }
  0xca   :  { %221 = vsyncpa [#allocation6], 1 }
  0xcb   :  { %222 = vsyncpa [#allocation9], 1 }
  0xcc   :  { %223 = vsyncpa [#allocation4], 1 }

// kernel: tpu_custom_call.1
= control target key start
LH: loop header
LB: loop body
LE: loop exit
PB: predicated region body
PF: predicated region fallthrough
CT: control target
= control target key end

     0   :  { %10 = vsyncpa [#allocation3], 0  ;;  %s460_s0 = inlined_call_operand.hbm [shape: f32[16,32], index: 0, kind: input, shape index: {}]   ;;  %s461_s1 = inlined_call_operand.hbm [shape: f32[16,32], index: 1, kind: input, shape index: {}]   ;;  %s462_s2 = inlined_call_operand.hbm [shape: f32[32,32], index: 2, kind: input, shape index: {}]   ;;  %s463_s3 = inlined_call_operand.hbm [shape: f32[32,32], index: 3, kind: input, shape index: {}]   ;;  %s464_s4 = inlined_call_operand.vmem [shape: f32[1,32], index: 4, kind: input, shape index: {}]   ;;  %s465_s5 = inlined_call_operand.hbm [shape: f32[16,32], index: 5, kind: output, shape index: {}]  }
   0x1   :  { %11 = vsyncpa [#allocation6], 0 }
   0x2   :  { %12 = vsyncpa [#allocation9], 0 }
   0x3   :  { %13 = vsyncpa [#allocation4], 0  ;;  %s31_s20 = sshll.u32 %s461_s1, 4  ;;  %s380_s21 = smov [#allocation5]   ;;  %s32_s20 = int_to_ptr.hbm [resolvable:$true] %s31_s20 }
   0x4   :  { %s33_s22 = sshll.u32 %s380_s21, 4  ;;  %s18_s25 = sshll.u32 %s460_s0, 4  ;;  %s34_s22 = int_to_ptr.vmem [resolvable:$true] %s33_s22  ;;  %s19_s25 = int_to_ptr.hbm [resolvable:$true] %s18_s25 }
   0x5   :  { %s381_s26 = smov 128   ;;  %s382_s27 = smov 8  }
   0x6   :  { %39 = dma.hbm_to_vmem [thread:$0]  %s32_s20, 256, %s34_s22, [#allocation6], %s381_s26, %s381_s26, %s382_s27  }
   0x7   :  { %s383_s28 = smov [#allocation2]   ;;  %s44_s1 = sshll.u32 %s462_s2, 4  ;;  %s45_s1 = int_to_ptr.hbm [resolvable:$true] %s44_s1 }
   0x8   :  { %s20_s29 = sshll.u32 %s383_s28, 4  ;;  %s57_s8 = sshll.u32 %s463_s3, 4  ;;  %s21_s29 = int_to_ptr.vmem [resolvable:$true] %s20_s29  ;;  %s58_s8 = int_to_ptr.hbm [resolvable:$true] %s57_s8 }
   0x9   :  { %26 = dma.hbm_to_vmem [thread:$0]  %s19_s25, 256, %s21_s29, [#allocation3], %s381_s26, %s381_s26, %s382_s27  }
   0xa   :  { %s384_s9 = smov [#allocation7]   ;;  %s385_s11 = smov [#allocation8]  }
   0xb   :  { %s46_s10 = sshll.u32 %s384_s9, 4  ;;  %s59_s2 = sshll.u32 %s385_s11, 4  ;;  %s47_s10 = int_to_ptr.vmem [resolvable:$true] %s46_s10  ;;  %s60_s2 = int_to_ptr.vmem [resolvable:$true] %s59_s2 }
   0xc   :  { %52 = dma.hbm_to_vmem [thread:$0]  %s45_s1, 512, %s47_s10, [#allocation6], %s381_s26, %s381_s26, %s382_s27  }
   0xd   :  { %65 = dma.hbm_to_vmem [thread:$0]  %s58_s8, 512, %s60_s2, [#allocation9], %s381_s26, %s381_s26, %s382_s27  }
   0xe   :  { %372 = dma.done.wait [#allocation3], 256  }
   0xf   :  { %373 = vsyncadd [#allocation3], 4294967040 }
  0x10   :  { %374 = dma.done.wait [#allocation6], 768  }
  0x11   :  { %375 = vsyncadd [#allocation6], 4294966528 }
  0x12   :  { %376 = dma.done.wait [#allocation9], 512  }
  0x13   :  { %377 = vsyncadd [#allocation9], 4294966784  ;;  %v95_v0 = vld [vmem:[#allocation8 + $0x18] sm:$0xff]  ;;  %v94_v2 = vld [vmem:[#allocation8 + $0x10] sm:$0xff]  ;;  %vm96_vm0 = vcmask 261120   ;;  %s209_s16 = sshll.u32 %s465_s5, 4  ;;  %s210_s16 = int_to_ptr.hbm [resolvable:$true] %s209_s16 }
  0x14   :  { %v91_v1 = vld [vmem:[#allocation7 + $0x18] sm:$0xff]  ;;  %115 = vmatpush.msra.mxu0 %v95_v0  ;;  %228 = vmatpush.msra.mxu2 %v95_v0  ;;  %v90_v3 = vld [vmem:[#allocation7 + $0x10] sm:$0xff]  ;;  %v93_v4 = vld [vmem:[#allocation8 + $0x8] sm:$0xff] }
  0x15   :  { %144 = vmatpush.msra.mxu1 %v91_v1  ;;  %232 = vmatpush.msra.mxu3 %v91_v1  ;;  %v89_v5 = vld [vmem:[#allocation7 + $0x8] sm:$0xff]  ;;  %v92_v6 = vld [vmem:[#allocation8] sm:$0xff]  ;;  %v84_v8 = vld [vmem:[#allocation5] sm:$0xff] }
  0x16   :  { %116 = vmatpush.msra.mxu0 %v94_v2  ;;  %229 = vmatpush.msra.mxu2 %v94_v2  ;;  %v88_v7 = vld [vmem:[#allocation7] sm:$0xff]  ;;  %v441_v9 = vld [vmem:[#allocation5 + $0x8] sm:$0xff]  ;;  %v87_v11 = vld [vmem:[#allocation2 + $0x8] sm:$0xff] }
  0x17   :  { %145 = vmatpush.msra.mxu1 %v90_v3  ;;  %233 = vmatpush.msra.mxu3 %v90_v3  ;;  %v86_v10 = vld [vmem:[#allocation2] sm:$0xff] }
  0x18   :  { %117 = vmatpush.msra.mxu0 %v93_v4  ;;  %230 = vmatpush.msra.mxu2 %v93_v4  ;;  %v243_v13 = vld [vmem:[%s464_s4] ss:$0 sm:$0xff]  ;;  %s386_s4 = smov [#allocation10]  }
  0x19   :  { %146 = vmatpush.msra.mxu1 %v89_v5  ;;  %234 = vmatpush.msra.mxu3 %v89_v5  ;;  %s207_s13 = sshll.u32 %s386_s4, 4  ;;  %s208_s13 = int_to_ptr.vmem [resolvable:$true] %s207_s13 }
  0x1a   :  { %118 = vmatpush.msra.mxu0 %v92_v6  ;;  %231 = vmatpush.msra.mxu2 %v92_v6 }
  0x1b   :  { %147 = vmatpush.msra.mxu1 %v88_v7  ;;  %235 = vmatpush.msra.mxu3 %v88_v7 }
  0x1c   :  { %224 = vmatmul.msk.f32.vlgmr.msra.gmra.mxu0 %vm96_vm0, %v84_v8  ;;  %225 = vmatmul.msk.f32.vlgmr.msra.gmra.mxu2 %vm96_vm0, %v441_v9 }
  0x1d   :  { %226 = vmatmul.msk.f32.vlgmr.msra.gmra.mxu1 %vm96_vm0, %v86_v10  ;;  %227 = vmatmul.msk.f32.vlgmr.msra.gmra.mxu3 %vm96_vm0, %v87_v11 }
  0x99   :  { %v120_v12 = vpop.f32.mrf.mxu0 }
  0x9a   :  { %v149_v14 = vpop.f32.mrf.mxu1 }
  0x9b   :  { %v150_v15 = vadd.f32 %v149_v14, %v120_v12 }
  0x9d   :  { %v159_v16 = vadd.f32 %v243_v13, %v150_v15 }
  0x9f   :  { %v161_v17 = vsub.f32 0.0, %v159_v16  ;;  %v123_v18 = vpop.f32.mrf.mxu2 }
  0xa0   :  { %v152_v19 = vpop.f32.mrf.mxu3 }
  0xa1   :  { %v163_v20 = vmul.f32 1.442695, %v161_v17  ;;  %v153_v21 = vadd.f32 %v152_v19, %v123_v18 }
  0xa3   :  { %244 = vpow2.f32 %v163_v20  ;;  %v160_v22 = vadd.f32 %v243_v13, %v153_v21 }
  0xa5   :  { %v162_v23 = vsub.f32 0.0, %v160_v22 }
  0xa7   :  { %v165_v24 = vmul.f32 1.442695, %v162_v23 }
  0xa9   :  { %v245_v25 = vpop.eup %244  ;;  %246 = vpow2.f32 %v165_v24 }
  0xaa   :  { %v167_v26 = vadd.f32 1.0, %v245_v25 }
  0xac   :  { %248 = vrcp.f32 %v167_v26  ;;  %v180_v32 = vand.u32 2147483648, %v167_v26  ;;  %vm174_vm1 = vweird.f32 %v167_v26  ;;  %v178_v34 = vand.u32 2147483647, %v167_v26 }
  0xae   :  { %v181_v38 = vor.u32 1.1754944e-38, %v180_v32  ;;  %vm179_vm4 = vcmp.eq.f32.partialorder %v178_v34, 8.507059e+37 }
  0xaf   :  { %v247_v27 = vpop.eup %246 }
  0xb0   :  { %v168_v28 = vadd.f32 1.0, %v247_v27 }
  0xb2   :  { %v249_v29 = vpop.eup %248  ;;  %250 = vrcp.f32 %v168_v28  ;;  %v195_v42 = vand.u32 2147483648, %v168_v28  ;;  %v193_v44 = vand.u32 2147483647, %v168_v28  ;;  %vm189_vm6 = vweird.f32 %v168_v28 }
  0xb3   :  { %v170_v30 = vmul.f32 %v249_v29, %v167_v26  ;;  %vm175_vm2 = vweird.f32 %v249_v29 }
  0xb4   :  { %vm176_vm3 = vmor %vm174_vm1, %vm175_vm2  ;;  %v196_v47 = vor.u32 1.1754944e-38, %v195_v42  ;;  %vm194_vm8 = vcmp.eq.f32.partialorder %v193_v44, 8.507059e+37 }
  0xb5   :  { %v171_v31 = vsub.f32 1.0, %v170_v30 }
  0xb7   :  { %v172_v33 = vmul.f32 %v249_v29, %v171_v31 }
  0xb8   :  { %v251_v35 = vpop.eup %250 }
  0xb9   :  { %v185_v36 = vmul.f32 %v251_v35, %v168_v28  ;;  %v173_v37 = vadd.f32 %v249_v29, %v172_v33  ;;  %vm190_vm5 = vweird.f32 %v251_v35 }
  0xba   :  { %vm191_vm7 = vmor %vm189_vm6, %vm190_vm5 }
  0xbb   :  { %v186_v39 = vsub.f32 1.0, %v185_v36  ;;  %v177_v40 = vsel %vm176_vm3, %v249_v29, %v173_v37 }
  0xbc   :  { %v182_v41 = vsel %vm179_vm4, %v181_v38, %v177_v40 }
  0xbd   :  { %v187_v43 = vmul.f32 %v251_v35, %v186_v39  ;;  %v199_v45 = vmul.f32 %v182_v41, %v84_v8 }
  0xbf   :  { %v188_v46 = vadd.f32 %v251_v35, %v187_v43  ;;  %201 = vst.msk [vmem:[#allocation10] sm:$0xff] %vm96_vm0, %v199_v45 }
  0xc1   :  { %v192_v48 = vsel %vm191_vm7, %v251_v35, %v188_v46 }
  0xc2   :  { %v197_v49 = vsel %vm194_vm8, %v196_v47, %v192_v48 }
  0xc3   :  { %v200_v50 = vmul.f32 %v197_v49, %v441_v9 }
  0xc5   :  { %202 = vst.msk [vmem:[#allocation10 + $0x8] sm:$0xff] %vm96_vm0, %v200_v50 }
  0xc6   :  { %215 = dma.vmem_to_hbm [thread:$0]  %s208_s13, 256, %s210_s16, [#allocation4], %s381_s26, %s381_s26, %s382_s27  }
  0xc7   :  { %378 = dma.done.wait [#allocation4], 256  }
  0xc8   :  { %379 = vsyncadd [#allocation4], 4294967040 }
  0xc9   :  { %220 = vsyncpa [#allocation3], 1 }
  0xca   :  { %221 = vsyncpa [#allocation6], 1 }
  0xcb   :  { %222 = vsyncpa [#allocation9], 1 }
  0xcc   :  { %223 = vsyncpa [#allocation4], 1 }

</bundles_post_ra>
